<compile_context>
chip_gen: v6e
topology: v6e:2x2x1
jax: 0.10.0
libtpu: 0.0.40
codegen_flags: <defaults>
</compile_context>

<pallas_src>
import math
from functools import partial

import jax
import jax.numpy as jnp
from jax.experimental import pallas as pl
from jax.experimental.pallas import tpu as pltpu

L2NORM_EPS = 1e-12  # matches torch.nn.functional.normalize default eps


# ----------------------------- kernels -----------------------------
def _ada_rmsnorm_rows_kernel(x_ref, c_ref, w_ref, o_ref, *, scale, eps2):
    # x_ref: (bm, D)   c_ref: (bm, Dc)   w_ref: (Dc, D)   o_ref: (bm, D)
    x = x_ref[...].astype(jnp.float32)                       # f32 accumulation
    sumsq = jnp.sum(x * x, axis=-1, keepdims=True)           # XLU reduce
    inv = scale * jax.lax.rsqrt(jnp.maximum(sumsq, eps2))    # EUP, == scale/max(||x||,eps)
    gamma = jnp.dot(c_ref[...], w_ref[...],
                    preferred_element_type=jnp.float32)      # MXU, (bm, D)
    o_ref[...] = (x * inv * (gamma + 1.0)).astype(o_ref.dtype)


def _ada_rmsnorm_groups_kernel(x_ref, c_ref, w_ref, o_ref, *, scale, eps2):
    # x_ref: (bg, N, D)   c_ref: (bg, Dc)   w_ref: (Dc, D)   o_ref: (bg, N, D)
    x = x_ref[...].astype(jnp.float32)
    sumsq = jnp.sum(x * x, axis=-1, keepdims=True)           # (bg, N, 1)
    inv = scale * jax.lax.rsqrt(jnp.maximum(sumsq, eps2))
    gamma = jnp.dot(c_ref[...], w_ref[...],
                    preferred_element_type=jnp.float32)      # (bg, D), once per group
    o_ref[...] = (x * inv * (gamma[:, None, :] + 1.0)).astype(o_ref.dtype)


# ----------------------------- tiling helpers -----------------------------
def _sublane(dtype):
    # Minimum second-to-last-dim multiple: 8 for 4-byte, 16 for 2-byte, 32 for 1-byte.
    return max(8, 32 // jnp.dtype(dtype).itemsize)


def _round_down(a, b):
    return (a // b) * b


def _round_up(a, b):
    return -(-a // b) * b


def _vmem_capacity():
    try:
        info = pltpu.get_tpu_info()
        cap = getattr(info, "vmem_capacity_bytes", None)
        if cap:
            return int(cap)
    except Exception:
        pass
    return 64 << 20  # v7x per-TC VMEM (smallest of current generations)


def _pick_block(n_major, bytes_per_major, fixed_bytes, sub, max_major=None):
    """Pick the major-dim block size from a VMEM byte budget.

    cdiv grid + masked partial last block means n_major need not be divisible;
    a full-extent block (== n_major) is always legal for small problems.
    """
    cap = _vmem_capacity()
    # ~24-28 MiB of working set is enough to amortize the ~0.35us/step overhead
    # even at v7x's 3.2 TB/s, while leaving headroom under its 64 MiB VMEM.
    budget = max(min(cap // 2, 28 << 20) - fixed_bytes, bytes_per_major * sub)
    blk = max(budget // bytes_per_major, 1)
    if max_major is not None:
        blk = min(blk, max_major)
    blk = min(blk, 8192)                       # diminishing returns past ~8K rows
    if blk >= n_major:
        blk = n_major                          # full-extent block (always legal)
    else:
        blk = max(sub, _round_down(blk, sub))
        steps = pl.cdiv(n_major, blk)
        if steps > 1 and steps % 2 == 1:       # even step count: v7x has 2 TCs
            cand = _round_up(pl.cdiv(n_major, steps + 1), sub)
            if sub <= cand <= blk:
                blk = cand
    used = blk * bytes_per_major + fixed_bytes
    vmem_limit = int(min(cap * 3 // 4, max(used + (8 << 20), 32 << 20)))
    return blk, vmem_limit


# ----------------------------- wrapper -----------------------------
def ada_rmsnorm(x, cond, w_gamma, *, eps=L2NORM_EPS, max_block_rows=None):
    """AdaRMSNorm forward.

    x        : (..., dim)
    cond     : broadcastable to (..., dim_cond); if constant over the token
               (second-to-last) axis, gamma is computed once per group.
    w_gamma  : (dim_cond, dim) == to_gamma.weight.T of the PyTorch module.
    """
    *lead, d = x.shape
    dc, d_out = w_gamma.shape
    assert d_out == d
    assert cond.shape[-1] == dc

    if cond.ndim < x.ndim:
        cond = cond.reshape((1,) * (x.ndim - cond.ndim) + cond.shape)
    assert cond.ndim == x.ndim

    scale = float(d) ** 0.5
    eps2 = float(eps) * float(eps)            # clamp on sum-of-squares == max(||x||, eps)
    itemsize = jnp.dtype(x.dtype).itemsize
    c_itemsize = jnp.dtype(cond.dtype).itemsize
    w_itemsize = jnp.dtype(w_gamma.dtype).itemsize
    w_bytes = 2 * dc * d * w_itemsize         # weight stays resident (double-buffered)

    grouped = len(lead) >= 1 and x.shape[-2] > 1 and cond.shape[-2] == 1
    if grouped:
        # ---- gamma once per (leading...) group; no (M, Dc) broadcast in HBM ----
        gdims, n = lead[:-1], lead[-1]
        g = math.prod(gdims) if gdims else 1
        xg = x.reshape(g, n, d)
        cg = jnp.broadcast_to(cond, (*gdims, 1, dc)).reshape(g, dc)  # tiny vs (M, Dc)

        bytes_per_group = (2 * 2 * n * d * itemsize      # x + out, double-buffered
                           + 2 * dc * c_itemsize         # cond, double-buffered
                           + 3 * n * d * 4)              # in-kernel f32 temporaries
        sub = _sublane(cond.dtype)
        max_g = None if max_block_rows is None else max(1, max_block_rows // n)
        bg, vmem_limit = _pick_block(g, bytes_per_group, w_bytes, sub, max_g)

        out = pl.pallas_call(
            partial(_ada_rmsnorm_groups_kernel, scale=scale, eps2=eps2),
            grid=(pl.cdiv(g, bg),),
            in_specs=[
                pl.BlockSpec((bg, n, d), lambda i: (i, 0, 0)),
                pl.BlockSpec((bg, dc), lambda i: (i, 0)),
                pl.BlockSpec((dc, d), lambda i: (0, 0)),   # gamma weight, VMEM-resident
            ],
            out_specs=pl.BlockSpec((bg, n, d), lambda i: (i, 0, 0)),
            out_shape=jax.ShapeDtypeStruct((g, n, d), x.dtype),
            compiler_params=pltpu.CompilerParams(
                dimension_semantics=("parallel",),
                vmem_limit_bytes=vmem_limit),
            cost_estimate=pl.CostEstimate(
                flops=2 * g * dc * d + 4 * g * n * d,
                transcendentals=g * n,
                bytes_accessed=2 * g * n * d * itemsize
                               + g * dc * c_itemsize + dc * d * w_itemsize),
        )(xg, cg, w_gamma)
        return out.reshape(*lead, d)

    # ---- per-token conditioning: lane-dense (M, dim) slab ----
    m = math.prod(lead) if lead else 1
    x2 = x.reshape(m, d)
    c2 = jnp.broadcast_to(cond, (*lead, dc)).reshape(m, dc)

    bytes_per_row = (2 * 2 * d * itemsize            # x + out, double-buffered
                     + 2 * dc * c_itemsize           # cond, double-buffered
                     + 3 * d * 4)                    # in-kernel f32 temporaries
    sub = max(_sublane(x.dtype), _sublane(cond.dtype))
    bm, vmem_limit = _pick_block(m, bytes_per_row, w_bytes, sub, max_block_rows)

    out = pl.pallas_call(
        partial(_ada_rmsnorm_rows_kernel, scale=scale, eps2=eps2),
        grid=(pl.cdiv(m, bm),),
        in_specs=[
            pl.BlockSpec((bm, d), lambda i: (i, 0)),
            pl.BlockSpec((bm, dc), lambda i: (i, 0)),
            pl.BlockSpec((dc, d), lambda i: (0, 0)),       # gamma weight, VMEM-resident
        ],
        out_specs=pl.BlockSpec((bm, d), lambda i: (i, 0)),
        out_shape=jax.ShapeDtypeStruct((m, d), x.dtype),
        compiler_params=pltpu.CompilerParams(
            dimension_semantics=("parallel",),
            vmem_limit_bytes=vmem_limit),
        cost_estimate=pl.CostEstimate(
            flops=2 * m * dc * d + 4 * m * d,
            transcendentals=m,
            bytes_accessed=2 * m * d * itemsize + m * dc * c_itemsize
                           + dc * d * w_itemsize),
    )(x2, c2, w_gamma)
    return out.reshape(*lead, d)


# ----------------------------- pure-JAX reference -----------------------------
def ada_rmsnorm_reference(x, cond, w_gamma, eps=L2NORM_EPS):
    scale = x.shape[-1] ** 0.5
    norm = jnp.sqrt(jnp.sum(x * x, axis=-1, keepdims=True))
    normed = x / jnp.maximum(norm, eps) * scale
    gamma = cond @ w_gamma
    return normed * (gamma + 1.0)


# ----------------------------- demo / test -----------------------------
if __name__ == "__main__":
    key = jax.random.PRNGKey(0)
    kx, kc, kw, kx2, kc2 = jax.random.split(key, 5)

    # --- case 1: per-(batch, time) conditioning -> grouped kernel (gamma once/group) ---
    B, T, N, D, DC = 2, 4, 16, 128, 64
    x = jax.random.normal(kx, (B, T, N, D), jnp.float32)
    cond = jax.random.normal(kc, (B, T, 1, DC), jnp.float32)
    # NOTE: the PyTorch module zero-initialises to_gamma.weight; a small random
    # weight is used here so the fused matmul / modulation path is exercised.
    w_gamma = jax.random.normal(kw, (DC, D), jnp.float32) * 0.02

    out = jax.block_until_ready(ada_rmsnorm(x, cond, w_gamma))
    ref = ada_rmsnorm_reference(x, cond, w_gamma)
    assert out.shape == (B, T, N, D)
    assert jnp.all(jnp.isfinite(out))
    assert jnp.allclose(out, ref, rtol=1e-4, atol=1e-5)

    # --- case 2: per-token conditioning, M not a multiple of the row block
    #     (exercises the cdiv grid + masked partial last block) ---
    M2 = 120
    x2 = jax.random.normal(kx2, (M2, D), jnp.float32)
    cond2 = jax.random.normal(kc2, (M2, DC), jnp.float32)
    out2 = jax.block_until_ready(ada_rmsnorm(x2, cond2, w_gamma, max_block_rows=32))
    ref2 = ada_rmsnorm_reference(x2, cond2, w_gamma)
    assert out2.shape == (M2, D)
    assert jnp.allclose(out2, ref2, rtol=1e-4, atol=1e-5)

    # --- case 3: bf16 activations (dtype-aware tiles, f32 accumulation in-kernel) ---
    xb = x.astype(jnp.bfloat16)
    outb = jax.block_until_ready(ada_rmsnorm(xb, cond, w_gamma))
    refb = ada_rmsnorm_reference(xb.astype(jnp.float32), cond, w_gamma)
    assert outb.dtype == jnp.bfloat16
    assert jnp.allclose(outb.astype(jnp.float32), refb, rtol=3e-2, atol=3e-2)

    print("KERNEL_OK")
</pallas_src>

<mosaic_0001>
module attributes {stable_mosaic.version = 11 : i64} {
  func.func @_ada_rmsnorm_groups_kernel(%arg0: i32, %arg1: memref<8x16x128xf32, #tpu.memory_space<vmem>>, %arg2: memref<8x64xf32, #tpu.memory_space<vmem>>, %arg3: memref<64x128xf32, #tpu.memory_space<vmem>>, %arg4: memref<8x16x128xf32, #tpu.memory_space<vmem>>) attributes {dimension_semantics = [#tpu.dimension_semantics<parallel>], iteration_bounds = array<i64: 1>, scalar_prefetch = 0 : i64, scratch_operands = 0 : i64, tpu.core_type = #tpu.core_type<tc>, window_params = [{transform_indices = @transform_0, window_bounds = array<i64: 8, 16, 128>}, {transform_indices = @transform_1, window_bounds = array<i64: 8, 64>}, {pipeline_mode = #tpu.pipeline_mode<synchronous>, transform_indices = @transform_2, window_bounds = array<i64: 64, 128>}, {transform_indices = @transform_3, window_bounds = array<i64: 8, 16, 128>}]} {
    %c0 = arith.constant 0 : index
    %c0_0 = arith.constant 0 : index
    %c0_1 = arith.constant 0 : index
    %0 = vector.load %arg1[%c0, %c0_0, %c0_1] : memref<8x16x128xf32, #tpu.memory_space<vmem>>, vector<8x16x128xf32>
    %1 = arith.mulf %0, %0 : vector<8x16x128xf32>
    %cst = arith.constant dense<0.000000e+00> : vector<8x16xf32>
    %2 = vector.multi_reduction <add>, %1, %cst [2] : vector<8x16x128xf32> to vector<8x16xf32>
    %3 = vector.shape_cast %2 : vector<8x16xf32> to vector<8x16x1xf32>
    %cst_2 = arith.constant 1.000000e-24 : f32
    %4 = vector.broadcast %cst_2 : f32 to vector<8x16x1xf32>
    %5 = arith.maximumf %3, %4 : vector<8x16x1xf32>
    %6 = math.rsqrt %5 : vector<8x16x1xf32>
    %cst_3 = arith.constant 11.3137083 : f32
    %7 = vector.broadcast %cst_3 : f32 to vector<8x16x1xf32>
    %8 = arith.mulf %7, %6 : vector<8x16x1xf32>
    %c0_4 = arith.constant 0 : index
    %c0_5 = arith.constant 0 : index
    %9 = vector.load %arg2[%c0_4, %c0_5] : memref<8x64xf32, #tpu.memory_space<vmem>>, vector<8x64xf32>
    %c0_6 = arith.constant 0 : index
    %c0_7 = arith.constant 0 : index
    %10 = vector.load %arg3[%c0_6, %c0_7] : memref<64x128xf32, #tpu.memory_space<vmem>>, vector<64x128xf32>
    %cst_8 = arith.constant dense<0.000000e+00> : vector<8x128xf32>
    %11 = tpu.matmul %9, %10, %cst_8 {dimension_numbers = #tpu.dot_dimension_numbers<[1], [0], [0], [1], [0, 0, 1, 1], [], []>} : vector<8x64xf32>, vector<64x128xf32>, vector<8x128xf32> -> vector<8x128xf32>
    %12 = vector.broadcast %8 : vector<8x16x1xf32> to vector<8x16x128xf32>
    %13 = arith.mulf %0, %12 : vector<8x16x128xf32>
    %14 = vector.shape_cast %11 : vector<8x128xf32> to vector<8x1x128xf32>
    %cst_9 = arith.constant 1.000000e+00 : f32
    %15 = vector.broadcast %cst_9 : f32 to vector<8x1x128xf32>
    %16 = arith.addf %14, %15 : vector<8x1x128xf32>
    %17 = vector.broadcast %16 : vector<8x1x128xf32> to vector<8x16x128xf32>
    %18 = arith.mulf %13, %17 : vector<8x16x128xf32>
    %c0_10 = arith.constant 0 : index
    %c0_11 = arith.constant 0 : index
    %c0_12 = arith.constant 0 : index
    %19 = vector.load %arg4[%c0_10, %c0_11, %c0_12] : memref<8x16x128xf32, #tpu.memory_space<vmem>>, vector<8x16x128xf32>
    tpu.vector_store %arg4[%c0_10, %c0_11, %c0_12], %18 {strides = array<i32>} : memref<8x16x128xf32, #tpu.memory_space<vmem>>, vector<8x16x128xf32>,
    return
  }
  func.func @transform_0(%arg0: i32) -> (i32, i32, i32) {
    %c0_i32 = arith.constant 0 : i32
    %c0_i32_0 = arith.constant 0 : i32
    %c0_i32_1 = arith.constant 0 : i32
    return %arg0, %c0_i32, %c0_i32_0 : i32, i32, i32
  }
  func.func @transform_1(%arg0: i32) -> (i32, i32) {
    %c0_i32 = arith.constant 0 : i32
    %c0_i32_0 = arith.constant 0 : i32
    return %arg0, %c0_i32 : i32, i32
  }
  func.func @transform_2(%arg0: i32) -> (i32, i32) {
    %c0_i32 = arith.constant 0 : i32
    %c0_i32_0 = arith.constant 0 : i32
    %c0_i32_1 = arith.constant 0 : i32
    return %c0_i32, %c0_i32_0 : i32, i32
  }
  func.func @transform_3(%arg0: i32) -> (i32, i32, i32) {
    %c0_i32 = arith.constant 0 : i32
    %c0_i32_0 = arith.constant 0 : i32
    %c0_i32_1 = arith.constant 0 : i32
    return %arg0, %c0_i32, %c0_i32_0 : i32, i32, i32
  }
}

</mosaic_0001>

<bundles_post_ra>
// kernel: tpu_custom_call.1
= control target key start
LH: loop header
LB: loop body
LE: loop exit
PB: predicated region body
PF: predicated region fallthrough
CT: control target
= control target key end

     0   :  { %8 = vsyncpa [#allocation3], 0  ;;  %s725_s0 = inlined_call_operand.hbm [shape: f32[8,16,128], index: 0, kind: input, shape index: {}]   ;;  %s726_s1 = inlined_call_operand.hbm [shape: f32[8,64], index: 1, kind: input, shape index: {}]   ;;  %s727_s2 = inlined_call_operand.hbm [shape: f32[64,128], index: 2, kind: input, shape index: {}]   ;;  %s728_s3 = inlined_call_operand.hbm [shape: f32[8,16,128], index: 3, kind: output, shape index: {}]  }
   0x1   :  { %9 = vsyncpa [#allocation6], 0 }
   0x2   :  { %10 = vsyncpa [#allocation4], 0  ;;  %s585_s12 = smov [#allocation5]   ;;  %s586_s14 = smov [#allocation2]  }
   0x3   :  { %s29_s13 = sshll.u32 %s585_s12, 4  ;;  %s16_s15 = sshll.u32 %s586_s14, 4  ;;  %s30_s13 = int_to_ptr.vmem [resolvable:$true] %s29_s13  ;;  %s17_s15 = int_to_ptr.vmem [resolvable:$true] %s16_s15 }
   0x4   :  { %s507_s16 = scalar_lea.vmem %s30_s13, 128  ;;  %p512_p1 = scmp.lt.s32.totalorder %s30_s13, %s30_s13 }
   0x5   :  { %p508_p0 = scmp.ne.s32.totalorder %s30_s13, %s507_s16  ;;  %p513_p2 = scmp.lt.s32.totalorder %s507_s16, %s507_s16 }
   0x7   :  { %p514_p3 = por %p513_p2, %p512_p1 }
   0x9   :  { %p515_p4 = pnand %p514_p3, %p508_p0 }
   0xb   :  { %518 = shalt.err (!%p515_p4)
}
   0xc   :  { %32 = dma.hbm_to_vmem [thread:$0]  %s726_s1, 128, %s30_s13, [#allocation6]  }
   0xd   :  { %s527_s19 = scalar_lea.vmem %s17_s15, 2048  ;;  %p532_p6 = scmp.lt.s32.totalorder %s17_s15, %s17_s15 }
   0xe   :  { %p528_p5 = scmp.ne.s32.totalorder %s17_s15, %s527_s19  ;;  %p533_p7 = scmp.lt.s32.totalorder %s527_s19, %s527_s19 }
  0x10   :  { %p534_p8 = por %p533_p7, %p532_p6 }
  0x12   :  { %p535_p9 = pnand %p534_p8, %p528_p5 }
  0x14   :  { %538 = shalt.err (!%p535_p9)
}
  0x15   :  { %s587_s20 = smov 128   ;;  %s588_s21 = smov 8  }
  0x16   :  { %22 = dma.hbm_to_vmem [thread:$0]  %s725_s0, 2048, %s17_s15, [#allocation3], %s587_s20, %s587_s20, %s588_s21  }
  0x17   :  { %s589_s24 = smov [#allocation7]  }
  0x18   :  { %s38_s25 = sshll.u32 %s589_s24, 4  ;;  %s39_s25 = int_to_ptr.vmem [resolvable:$true] %s38_s25 }
  0x19   :  { %s547_s1 = scalar_lea.vmem %s39_s25, 1024  ;;  %p552_p11 = scmp.lt.s32.totalorder %s39_s25, %s39_s25 }
  0x1a   :  { %p548_p10 = scmp.ne.s32.totalorder %s39_s25, %s547_s1  ;;  %p553_p12 = scmp.lt.s32.totalorder %s547_s1, %s547_s1 }
  0x1c   :  { %p554_p13 = por %p553_p12, %p552_p11 }
  0x1e   :  { %p555_p0 = pnand %p554_p13, %p548_p10 }
  0x20   :  { %558 = shalt.err (!%p555_p0)
}
  0x21   :  { %44 = dma.hbm_to_vmem [thread:$0]  %s727_s2, 1024, %s39_s25, [#allocation6], %s587_s20, %s587_s20, %s588_s21  }
  0x22   :  { %579 = dma.done.wait [#allocation3], 2048  }
  0x23   :  { %580 = vsyncadd [#allocation3], 4294965248 }
  0x24   :  { %581 = dma.done.wait [#allocation6], 1152  }
  0x25   :  { %582 = vsyncadd [#allocation6], 4294966144  ;;  %v590_v0 = vmov 0.0   ;;  %vm591_vm0 = vmmov 0   ;;  %v174_v1 = vld [vmem:[#allocation7 + $0x38] sm:$0xff]  ;;  %v173_v2 = vld [vmem:[#allocation7 + $0x30] sm:$0xff] }
  0x26   :  { %439 = vmatprep.subr.mxu0 %v590_v0  ;;  %455 = vmatprep.mubr.msk.f32.mxu0 %vm591_vm0, %v590_v0  ;;  %v172_v3 = vld [vmem:[#allocation7 + $0x28] sm:$0xff]  ;;  %v631_v5 = vld [vmem:[#allocation2] sm:$0xff]  ;;  %v633_v6 = vld [vmem:[#allocation2 + $0x18] sm:$0xff]  ;;  %vm175_vm1 = vcmask 523264   ;;  %s593_s0 = smov [#allocation8]  }
  0x27   :  { %440 = vmatpush3.msra.mxu0 %v174_v1  ;;  %v629_v4 = vld [vmem:[#allocation2 + $0x10] sm:$0xff]  ;;  %v171_v7 = vld [vmem:[#allocation7 + $0x20] sm:$0xff]  ;;  %v70_v9 = vmul.f32 %v631_v5, %v631_v5  ;;  %v170_v11 = vld [vmem:[#allocation7 + $0x18] sm:$0xff]  ;;  %v73_v12 = vmul.f32 %v633_v6, %v633_v6  ;;  %s416_s2 = sshll.u32 %s593_s0, 4  ;;  %s417_s2 = int_to_ptr.vmem [resolvable:$true] %s416_s2 }
  0x28   :  { %441 = vmatprep.subr.mxu0 %v590_v0  ;;  %v72_v8 = vmul.f32 %v629_v4, %v629_v4  ;;  %v639_v10 = vld [vmem:[#allocation2 + $0x8] sm:$0xff]  ;;  %v169_v15 = vld [vmem:[#allocation7 + $0x10] sm:$0xff]  ;;  %v647_v16 = vld [vmem:[#allocation2 + $0x20] sm:$0xff]  ;;  %s559_s28 = scalar_lea.vmem %s417_s2, 2048  ;;  %p564_p2 = scmp.lt.s32.totalorder %s417_s2, %s417_s2 }
  0x29   :  { %442 = vmatpush3.msra.mxu0 %v173_v2  ;;  %86 = vadd.xlane.f32.xlu0 %v70_v9  ;;  %v71_v13 = vmul.f32 %v639_v10, %v639_v10  ;;  %v645_v14 = vld [vmem:[#allocation2 + $0x28] sm:$0xff]  ;;  %v168_v17 = vld [vmem:[#allocation7 + $0x8] sm:$0xff]  ;;  %v74_v19 = vmul.f32 %v647_v16, %v647_v16  ;;  %v653_v20 = vld [vmem:[#allocation2 + $0x38] sm:$0xff]  ;;  %p560_p1 = scmp.ne.s32.totalorder %s417_s2, %s559_s28  ;;  %p565_p3 = scmp.lt.s32.totalorder %s559_s28, %s559_s28 }
  0x2a   :  { %443 = vmatprep.subr.mxu0 %v590_v0  ;;  %90 = vadd.xlane.f32.xlu1 %v72_v8  ;;  %v75_v18 = vmul.f32 %v645_v14, %v645_v14  ;;  %v167_v21 = vld [vmem:[#allocation7] sm:$0xff]  ;;  %v655_v22 = vld [vmem:[#allocation2 + $0x30] sm:$0xff]  ;;  %v166_v23 = vld [vmem:[#allocation5] sm:$0xff]  ;;  %v77_v24 = vmul.f32 %v653_v20, %v653_v20 }
  0x2b   :  { %444 = vmatpush3.msra.mxu0 %v172_v3  ;;  %v76_v25 = vmul.f32 %v655_v22, %v655_v22  ;;  %v661_v26 = vld [vmem:[#allocation2 + $0x48] sm:$0xff]  ;;  %v663_v27 = vld [vmem:[#allocation2 + $0x40] sm:$0xff]  ;;  %v669_v30 = vld [vmem:[#allocation2 + $0x58] sm:$0xff]  ;;  %p566_p4 = por %p565_p3, %p564_p2 }
  0x2c   :  { %445 = vmatprep.subr.mxu0 %v590_v0  ;;  %v79_v28 = vmul.f32 %v661_v26, %v661_v26  ;;  %v78_v29 = vmul.f32 %v663_v27, %v663_v27  ;;  %v671_v31 = vld [vmem:[#allocation2 + $0x50] sm:$0xff]  ;;  %v81_v32 = vmul.f32 %v669_v30, %v669_v30  ;;  %v677_v34 = vld [vmem:[#allocation2 + $0x68] sm:$0xff]  ;;  %v679_v35 = vld [vmem:[#allocation2 + $0x60] sm:$0xff] }
  0x2d   :  { %446 = vmatpush3.msra.mxu0 %v171_v7  ;;  %88 = vadd.xlane.f32.xlu0 %v71_v13  ;;  %v80_v33 = vmul.f32 %v671_v31, %v671_v31  ;;  %v83_v36 = vmul.f32 %v677_v34, %v677_v34  ;;  %v82_v37 = vmul.f32 %v679_v35, %v679_v35  ;;  %v685_v38 = vld [vmem:[#allocation2 + $0x78] sm:$0xff]  ;;  %v687_v39 = vld [vmem:[#allocation2 + $0x70] sm:$0xff]  ;;  %p567_p5 = pnand %p566_p4, %p560_p1 }
  0x2e   :  { %447 = vmatprep.subr.mxu0 %v590_v0  ;;  %92 = vadd.xlane.f32.xlu1 %v73_v12  ;;  %v85_v40 = vmul.f32 %v685_v38, %v685_v38  ;;  %v84_v41 = vmul.f32 %v687_v39, %v687_v39 }
  0x2f   :  { %448 = vmatpush3.msra.mxu0 %v170_v11 }
  0x30   :  { %449 = vmatprep.subr.mxu0 %v590_v0 }
  0x31   :  { %450 = vmatpush3.msra.mxu0 %v169_v15  ;;  %94 = vadd.xlane.f32.xlu0 %v74_v19 }
  0x32   :  { %451 = vmatprep.subr.mxu0 %v590_v0  ;;  %96 = vadd.xlane.f32.xlu1 %v75_v18 }
  0x33   :  { %452 = vmatpush3.msra.mxu0 %v168_v17 }
  0x34   :  { %453 = vmatprep.subr.mxu0 %v590_v0 }
  0x35   :  { %454 = vmatpush3.msra.mxu0 %v167_v21  ;;  %98 = vadd.xlane.f32.xlu0 %v76_v25  ;;  %v270_v25 = vlaneseq }
  0x36   :  { %456 = vmatmul.mubr.msk.f32.vlgmr.msra.gmra.mxu0 %vm175_vm1, %v166_v23  ;;  %100 = vadd.xlane.f32.xlu1 %v77_v24  ;;  %v592_v23 = vmov 1966171168  }
  0x37   :  { %v268_v24 = vunpack.c.l.s4 %v592_v23 }
  0x39   :  { %102 = vadd.xlane.f32.xlu0 %v78_v29 }
  0x3a   :  { %104 = vadd.xlane.f32.xlu1 %v79_v28 }
  0x3d   :  { %106 = vadd.xlane.f32.xlu0 %v80_v33 }
  0x3e   :  { %108 = vadd.xlane.f32.xlu1 %v81_v32 }
  0x41   :  { %110 = vadd.xlane.f32.xlu0 %v82_v37  ;;  %v271_v37 = vshrl.u32 %v270_v25, 7 }
  0x42   :  { %112 = vadd.xlane.f32.xlu1 %v83_v36  ;;  %v269_v36 = vunpack.c.0.s8 %v268_v24 }
  0x45   :  { %114 = vadd.xlane.f32.xlu0 %v84_v41 }
  0x46   :  { %116 = vadd.xlane.f32.xlu1 %v85_v40 }
  0xb2   :  { %v87_v43 = vpop.xlane.xlu0 %86 }
  0xb3   :  { %v91_v42 = vpop.xlane.xlu1 %90  ;;  %v118_v54 = vmax.f32 %v87_v43, 1e-24 }
  0xb4   :  { %v120_v53 = vmax.f32 %v91_v42, 1e-24 }
  0xb6   :  { %v89_v45 = vpop.xlane.xlu0 %88  ;;  %467 = vrsqrt.f32 %v120_v53 }
  0xb7   :  { %v93_v44 = vpop.xlane.xlu1 %92  ;;  %v119_v57 = vmax.f32 %v89_v45, 1e-24  ;;  %469 = vrsqrt.f32 %v118_v54 }
  0xb8   :  { %v121_v56 = vmax.f32 %v93_v44, 1e-24 }
  0xba   :  { %v95_v47 = vpop.xlane.xlu0 %94  ;;  %471 = vrsqrt.f32 %v121_v56 }
  0xbb   :  { %v97_v46 = vpop.xlane.xlu1 %96  ;;  %v122_v59 = vmax.f32 %v95_v47, 1e-24  ;;  %473 = vrsqrt.f32 %v119_v57 }
  0xbc   :  { %v123_v58 = vmax.f32 %v97_v46, 1e-24 }
  0xbe   :  { %v99_v49 = vpop.xlane.xlu0 %98  ;;  %475 = vrsqrt.f32 %v123_v58 }
  0xbf   :  { %v101_v48 = vpop.xlane.xlu1 %100  ;;  %v124_v62 = vmax.f32 %v99_v49, 1e-24  ;;  %477 = vrsqrt.f32 %v122_v59 }
  0xc0   :  { %v125_v61 = vmax.f32 %v101_v48, 1e-24 }
  0xc2   :  { %v103_v51 = vpop.xlane.xlu0 %102  ;;  %479 = vrsqrt.f32 %v125_v61 }
  0xc3   :  { %v105_v50 = vpop.xlane.xlu1 %104  ;;  %v126_v1 = vmax.f32 %v103_v51, 1e-24  ;;  %481 = vrsqrt.f32 %v124_v62  ;;  %v468_v15 = vpop.eup %467  ;;  %v272_v51 = vsub.s32 %v269_v36, %v271_v37 }
  0xc4   :  { %v127_v0 = vmax.f32 %v105_v50, 1e-24  ;;  %v470_v17 = vpop.eup %469  ;;  %v152_v41 = vmul.f32 11.313708, %v468_v15 }
  0xc5   :  { %v150_v43 = vmul.f32 11.313708, %v470_v17 }
  0xc6   :  { %v107_v55 = vpop.xlane.xlu0 %106  ;;  %483 = vrsqrt.f32 %v127_v0  ;;  %v251_v53 = vmul.f32 %v152_v41, %v629_v4 }
  0xc7   :  { %v109_v52 = vpop.xlane.xlu1 %108  ;;  %v128_v3 = vmax.f32 %v107_v55, 1e-24  ;;  %485 = vrsqrt.f32 %v126_v1  ;;  %v472_v18 = vpop.eup %471  ;;  %v694_v55 = vsub.s32 0, %v271_v37  ;;  %v249_v57 = vmul.f32 %v150_v43, %v631_v5 }
  0xc8   :  { %v129_v2 = vmax.f32 %v109_v52, 1e-24  ;;  %v474_v19 = vpop.eup %473  ;;  %v153_v44 = vmul.f32 11.313708, %v472_v18 }
  0xc9   :  { %v151_v45 = vmul.f32 11.313708, %v474_v19 }
  0xca   :  { %v111_v63 = vpop.xlane.xlu0 %110  ;;  %487 = vrsqrt.f32 %v129_v2  ;;  %v252_v58 = vmul.f32 %v153_v44, %v633_v6 }
  0xcb   :  { %v113_v60 = vpop.xlane.xlu1 %112  ;;  %v130_v9 = vmax.f32 %v111_v63, 1e-24  ;;  %489 = vrsqrt.f32 %v128_v3  ;;  %v476_v21 = vpop.eup %475  ;;  %v250_v59 = vmul.f32 %v151_v45, %v639_v10 }
  0xcc   :  { %v131_v8 = vmax.f32 %v113_v60, 1e-24  ;;  %v478_v28 = vpop.eup %477  ;;  %v155_v47 = vmul.f32 11.313708, %v476_v21 }
  0xcd   :  { %v154_v49 = vmul.f32 11.313708, %v478_v28 }
  0xce   :  { %v115_v11 = vpop.xlane.xlu0 %114  ;;  %491 = vrsqrt.f32 %v131_v8  ;;  %v254_v61 = vmul.f32 %v155_v47, %v645_v14 }
  0xcf   :  { %v117_v7 = vpop.xlane.xlu1 %116  ;;  %v132_v13 = vmax.f32 %v115_v11, 1e-24  ;;  %493 = vrsqrt.f32 %v130_v9  ;;  %v480_v29 = vpop.eup %479  ;;  %v253_v4 = vmul.f32 %v154_v49, %v647_v16 }
  0xd0   :  { %v133_v12 = vmax.f32 %v117_v7, 1e-24  ;;  %v482_v32 = vpop.eup %481  ;;  %v157_v50 = vmul.f32 11.313708, %v480_v29 }
  0xd1   :  { %v156_v54 = vmul.f32 11.313708, %v482_v32 }
  0xd2   :  { %495 = vrsqrt.f32 %v133_v12  ;;  %v256_v3 = vmul.f32 %v157_v50, %v653_v20 }
  0xd3   :  { %497 = vrsqrt.f32 %v132_v13  ;;  %v484_v33 = vpop.eup %483  ;;  %v255_v5 = vmul.f32 %v156_v54, %v655_v22 }
  0xd4   :  { %v486_v40 = vpop.eup %485  ;;  %v159_v60 = vmul.f32 11.313708, %v484_v33 }
  0xd5   :  { %v158_v62 = vmul.f32 11.313708, %v486_v40 }
  0xd6   :  { %v258_v12 = vmul.f32 %v159_v60, %v661_v26 }
  0xd7   :  { %v488_v42 = vpop.eup %487  ;;  %v257_v17 = vmul.f32 %v158_v62, %v663_v27 }
  0xd8   :  { %v490_v46 = vpop.eup %489  ;;  %v161_v63 = vmul.f32 11.313708, %v488_v42 }
  0xd9   :  { %v160_v0 = vmul.f32 11.313708, %v490_v46 }
  0xda   :  { %v260_v18 = vmul.f32 %v161_v63, %v669_v30 }
  0xdb   :  { %v492_v48 = vpop.eup %491  ;;  %v259_v16 = vmul.f32 %v160_v0, %v671_v31 }
  0xdc   :  { %v494_v52 = vpop.eup %493  ;;  %v163_v9 = vmul.f32 11.313708, %v492_v48 }
  0xdd   :  { %v162_v6 = vmul.f32 11.313708, %v494_v52 }
  0xde   :  { %v262_v24 = vmul.f32 %v163_v9, %v677_v34 }
  0xdf   :  { %v496_v56 = vpop.eup %495  ;;  %v261_v25 = vmul.f32 %v162_v6, %v679_v35 }
  0xe0   :  { %v498_v2 = vpop.eup %497  ;;  %v165_v11 = vmul.f32 11.313708, %v496_v56 }
  0xe1   :  { %v164_v20 = vmul.f32 11.313708, %v498_v2 }
  0xe2   :  { %v264_v26 = vmul.f32 %v165_v11, %v685_v38 }
  0xe3   :  { %v263_v30 = vmul.f32 %v164_v20, %v687_v39 }
  0xf6   :  { %v245_v1 = vpop.f32.mrf.mxu0 }
  0xf7   :  { %v266_v7 = vcombine.high %v245_v1, %v245_v1  ;;  %v273_v8 = vrot.slane %v245_v1, %v272_v51 }
  0xf8   :  { %v457_v10 = vpop.f32.mrf.mxu0 }
  0xf9   :  { %v280_v14 = vrot.slane %v266_v7, %v272_v51  ;;  %v281_v13 = vcombine.high %v273_v8, %v273_v8  ;;  %v289_v15 = vrot.slane %v273_v8, %v272_v51 }
  0xfb   :  { %v282_v19 = vcombine.high %v280_v14, %v280_v14  ;;  %v296_v21 = vrot.slane %v280_v14, %v272_v51  ;;  %v303_v23 = vrot.slane %v281_v13, %v272_v51  ;;  %v311_v22 = vcombine.high %v289_v15, %v289_v15 }
  0xfc   :  { %v323_v28 = vadd.f32 1.0, %v289_v15 }
  0xfd   :  { %v310_v29 = vrot.slane %v282_v19, %v272_v51  ;;  %v312_v32 = vcombine.high %v296_v21, %v296_v21  ;;  %v313_v33 = vcombine.high %v303_v23, %v303_v23  ;;  %v324_v27 = vadd.f32 1.0, %v303_v23 }
  0xfe   :  { %v325_v36 = vadd.f32 1.0, %v311_v22  ;;  %v327_v31 = vadd.f32 1.0, %v296_v21  ;;  %v342_v37 = vrot.slane %v323_v28, %v694_v55 }
  0xff   :  { %v314_v40 = vcombine.high %v310_v29, %v310_v29  ;;  %v326_v41 = vadd.f32 1.0, %v313_v33  ;;  %v328_v42 = vadd.f32 1.0, %v310_v29  ;;  %v329_v43 = vadd.f32 1.0, %v312_v32 }
 0x100   :  { %v346_v34 = vrot.slane %v324_v27, %v694_v55  ;;  %v350_v35 = vrot.slane %v325_v36, %v694_v55  ;;  %v358_v38 = vrot.slane %v327_v31, %v694_v55  ;;  %v379_v44 = vmul.f32 %v342_v37, %v249_v57 }
 0x101   :  { %v330_v45 = vadd.f32 1.0, %v314_v40  ;;  %v354_v46 = vrot.slane %v326_v41, %v694_v55  ;;  %v362_v39 = vrot.slane %v328_v42, %v694_v55  ;;  %v366_v47 = vrot.slane %v329_v43, %v694_v55 }
 0x102   :  { %v380_v48 = vmul.f32 %v342_v37, %v250_v59  ;;  %v381_v49 = vmul.f32 %v346_v34, %v251_v53  ;;  %v382_v50 = vmul.f32 %v346_v34, %v252_v58  ;;  %v383_v51 = vmul.f32 %v350_v35, %v253_v4  ;;  %395 = vst [vmem:[#allocation8] sm:$0xff] %v379_v44 }
 0x103   :  { %v370_v52 = vrot.slane %v330_v45, %v694_v55  ;;  %v384_v54 = vmul.f32 %v350_v35, %v254_v61  ;;  %v385_v56 = vmul.f32 %v354_v46, %v255_v5  ;;  %v386_v60 = vmul.f32 %v354_v46, %v256_v3 }
 0x104   :  { %v387_v57 = vmul.f32 %v358_v38, %v257_v17  ;;  %v388_v62 = vmul.f32 %v358_v38, %v258_v12  ;;  %v389_v63 = vmul.f32 %v362_v39, %v259_v16  ;;  %v390_v0 = vmul.f32 %v362_v39, %v260_v18  ;;  %396 = vst [vmem:[#allocation8 + $0x8] sm:$0xff] %v380_v48 }
 0x105   :  { %397 = vst [vmem:[#allocation8 + $0x10] sm:$0xff] %v381_v49  ;;  %398 = vst [vmem:[#allocation8 + $0x18] sm:$0xff] %v382_v50  ;;  %v391_v59 = vmul.f32 %v366_v47, %v261_v25  ;;  %v392_v53 = vmul.f32 %v366_v47, %v262_v24  ;;  %v393_v58 = vmul.f32 %v370_v52, %v263_v30 }
 0x106   :  { %399 = vst [vmem:[#allocation8 + $0x20] sm:$0xff] %v383_v51  ;;  %v394_v1 = vmul.f32 %v370_v52, %v264_v26  ;;  %400 = vst [vmem:[#allocation8 + $0x28] sm:$0xff] %v384_v54 }
 0x107   :  { %401 = vst [vmem:[#allocation8 + $0x30] sm:$0xff] %v385_v56  ;;  %402 = vst [vmem:[#allocation8 + $0x38] sm:$0xff] %v386_v60 }
 0x108   :  { %403 = vst [vmem:[#allocation8 + $0x40] sm:$0xff] %v387_v57  ;;  %404 = vst [vmem:[#allocation8 + $0x48] sm:$0xff] %v388_v62 }
 0x109   :  { %405 = vst [vmem:[#allocation8 + $0x50] sm:$0xff] %v389_v63  ;;  %406 = vst [vmem:[#allocation8 + $0x58] sm:$0xff] %v390_v0 }
 0x10a   :  { %407 = vst [vmem:[#allocation8 + $0x60] sm:$0xff] %v391_v59  ;;  %408 = vst [vmem:[#allocation8 + $0x68] sm:$0xff] %v392_v53 }
 0x10b   :  { %409 = vst [vmem:[#allocation8 + $0x70] sm:$0xff] %v393_v58  ;;  %410 = vst [vmem:[#allocation8 + $0x78] sm:$0xff] %v394_v1 }
 0x10c   :  { %570 = shalt.err (!%p567_p5)
}
 0x10d   :  { %422 = dma.vmem_to_hbm [thread:$0]  %s417_s2, 2048, %s728_s3, [#allocation4], %s587_s20, %s587_s20, %s588_s21  }
 0x10e   :  { %583 = dma.done.wait [#allocation4], 2048  }
 0x10f   :  { %584 = vsyncadd [#allocation4], 4294965248 }
 0x110   :  { %426 = vsyncpa [#allocation3], 1 }
 0x111   :  { %427 = vsyncpa [#allocation6], 1 }
 0x112   :  { %428 = vsyncpa [#allocation4], 1 }

</bundles_post_ra>
